<compile_context>
chip_gen: v5e
topology: v5e:2x2
jax: 0.10.0
libtpu: 0.0.40
codegen_flags: <defaults>
</compile_context>

<pallas_src>
import functools

import jax
import jax.numpy as jnp
from jax.experimental import pallas as pl
from jax.experimental.pallas import tpu as pltpu


def _round_up(x, m):
    return ((x + m - 1) // m) * m


def actor_kernel(state_ref, goal_ref, w_ref, p_ref, out_ref, *,
                 S, G, H, A, Kpad, bf16_matmul):
    # MXU matmul helper: optionally feed bf16 operands, always accumulate f32.
    if bf16_matmul:
        def mm(x, y):
            return jnp.dot(x.astype(jnp.bfloat16), y.astype(jnp.bfloat16),
                           preferred_element_type=jnp.float32)
    else:
        def mm(x, y):
            return jnp.dot(x, y, preferred_element_type=jnp.float32)

    w = w_ref[...]   # (3*Kpad, Npad) packed [W1; W2; W3], f32
    p = p_ref[...]   # (5, Npad) packed [b1; b2; b3; bounds; offset], f32

    b1 = p[0:1, :H]
    b2 = p[1:2, :H]
    b3 = p[2:3, :A]
    bounds = p[3:4, :A]
    offset = p[4:5, :A]

    # Layer 1: concat([state, goal], 1) @ W1 fused as two partial matmuls
    # against static row-slices of the packed W1.
    h1 = mm(state_ref[...], w[:S, :H]) + mm(goal_ref[...], w[S:S + G, :H])
    h1 = jnp.maximum(h1 + b1, 0.0)

    # Layer 2
    h2 = jnp.maximum(mm(h1, w[Kpad:Kpad + H, :H]) + b2, 0.0)

    # Layer 3 + tanh + action scaling (all elementwise work stays f32)
    a = jnp.tanh(mm(h2, w[2 * Kpad:2 * Kpad + H, :A]) + b3)
    out_ref[...] = a * bounds + offset


def pack_params(params):
    """Pack 8 tiny parameter tensors into 2 DMA-friendly buffers.

    Do this once per parameter update, NOT per forward call.
      W_packed: (3*Kpad, Npad) f32 — rows [0:D_in]          = W1 (D_in, H)
                                     rows [Kpad:Kpad+H]      = W2 (H, H)
                                     rows [2*Kpad:2*Kpad+H]  = W3 (H, A)
      P_packed: (5, Npad) f32 — rows = b1, b2, b3, bounds, offset (lane 0..)
    """
    w1, b1, w2, b2, w3, b3, bounds, offset = params
    d_in, H = w1.shape
    A = w3.shape[1]
    Kpad = _round_up(max(d_in, H), 8)
    Npad = _round_up(max(H, A), 128)

    W = jnp.zeros((3 * Kpad, Npad), jnp.float32)
    W = W.at[:d_in, :H].set(w1.astype(jnp.float32))
    W = W.at[Kpad:Kpad + H, :H].set(w2.astype(jnp.float32))
    W = W.at[2 * Kpad:2 * Kpad + H, :A].set(w3.astype(jnp.float32))

    P = jnp.zeros((5, Npad), jnp.float32)
    P = P.at[0, :H].set(b1.reshape(-1).astype(jnp.float32))
    P = P.at[1, :H].set(b2.reshape(-1).astype(jnp.float32))
    P = P.at[2, :A].set(b3.reshape(-1).astype(jnp.float32))
    P = P.at[3, :A].set(bounds.reshape(-1).astype(jnp.float32))
    P = P.at[4, :A].set(offset.reshape(-1).astype(jnp.float32))
    return W, P, (H, A)


@functools.partial(jax.jit,
                   static_argnames=("hidden", "action_dim", "batch_tile",
                                    "bf16_matmul"))
def actor_forward(state, goal, W_packed, P_packed, *, hidden, action_dim,
                  batch_tile=1024, bf16_matmul=False):
    """state: (B, state_dim), goal: (B, goal_dim) -> (B, action_dim)."""
    B, S = state.shape
    Bg, G = goal.shape
    assert B == Bg
    Kpad = W_packed.shape[0] // 3

    # Small batches: one full block. Large batches: TB-row tiles (multiple of 8)
    # pipelined over a "parallel" grid axis (megacore-shardable on v7x).
    TB = B if B <= batch_tile else batch_tile
    grid = (pl.cdiv(B, TB),)

    kernel = functools.partial(actor_kernel, S=S, G=G, H=hidden, A=action_dim,
                               Kpad=Kpad, bf16_matmul=bf16_matmul)

    return pl.pallas_call(
        kernel,
        out_shape=jax.ShapeDtypeStruct((B, action_dim), jnp.float32),
        grid=grid,
        in_specs=[
            pl.BlockSpec((TB, S), lambda i: (i, 0)),          # batch-tiled
            pl.BlockSpec((TB, G), lambda i: (i, 0)),          # batch-tiled
            pl.BlockSpec(W_packed.shape, lambda i: (0, 0)),   # VMEM-resident
            pl.BlockSpec(P_packed.shape, lambda i: (0, 0)),   # VMEM-resident
        ],
        out_specs=pl.BlockSpec((TB, action_dim), lambda i: (i, 0)),
        compiler_params=pltpu.CompilerParams(
            dimension_semantics=("parallel",)),
    )(state.astype(jnp.float32), goal.astype(jnp.float32), W_packed, P_packed)


def init_params(key, state_dim, goal_dim, action_dim, hidden=64):
    """Deterministic synthetic init (PyTorch-Linear-style uniform fan_in bounds)."""
    d_in = state_dim + goal_dim
    keys = jax.random.split(key, 8)

    def linear(kw, kb, fan_in, fan_out):
        lim = 1.0 / jnp.sqrt(jnp.float32(fan_in))
        w = jax.random.uniform(kw, (fan_in, fan_out), jnp.float32, -lim, lim)
        b = jax.random.uniform(kb, (1, fan_out), jnp.float32, -lim, lim)
        return w, b

    w1, b1 = linear(keys[0], keys[1], d_in, hidden)
    w2, b2 = linear(keys[2], keys[3], hidden, hidden)
    w3, b3 = linear(keys[4], keys[5], hidden, action_dim)
    # env-provided action bounds / offsets (deterministic synthetic values)
    bounds = jax.random.uniform(keys[6], (1, action_dim), jnp.float32, 0.5, 1.5)
    offset = jax.random.uniform(keys[7], (1, action_dim), jnp.float32, -0.5, 0.5)
    return (w1, b1, w2, b2, w3, b3, bounds, offset)


def actor_forward_ref(state, goal, params):
    w1, b1, w2, b2, w3, b3, bounds, offset = params
    x = jnp.concatenate([state, goal], axis=1)
    h1 = jax.nn.relu(x @ w1 + b1)
    h2 = jax.nn.relu(h1 @ w2 + b2)
    return jnp.tanh(h2 @ w3 + b3) * bounds + offset


if __name__ == "__main__":
    key = jax.random.PRNGKey(0)
    batch, state_dim, goal_dim, action_dim, hidden = 8, 16, 8, 4, 64

    k_state, k_goal, k_params = jax.random.split(key, 3)
    state = jax.random.normal(k_state, (batch, state_dim), jnp.float32)
    goal = jax.random.normal(k_goal, (batch, goal_dim), jnp.float32)
    params = init_params(k_params, state_dim, goal_dim, action_dim, hidden)

    W_packed, P_packed, (H, A) = pack_params(params)

    # 1) small batch, single-block path (f32 matmul)
    out = actor_forward(state, goal, W_packed, P_packed, hidden=H, action_dim=A)
    out = jax.block_until_ready(out)
    ref = actor_forward_ref(state, goal, params)
    assert out.shape == (batch, action_dim)
    assert jnp.allclose(out, ref, atol=1e-5, rtol=1e-5), \
        float(jnp.max(jnp.abs(out - ref)))

    # 2) batch-tiled grid path (multiple grid steps on the "parallel" axis)
    B2 = 48
    k_s2, k_g2 = jax.random.split(jax.random.PRNGKey(1))
    state2 = jax.random.normal(k_s2, (B2, state_dim), jnp.float32)
    goal2 = jax.random.normal(k_g2, (B2, goal_dim), jnp.float32)
    out2 = jax.block_until_ready(
        actor_forward(state2, goal2, W_packed, P_packed,
                      hidden=H, action_dim=A, batch_tile=16))
    ref2 = actor_forward_ref(state2, goal2, params)
    assert jnp.allclose(out2, ref2, atol=1e-5, rtol=1e-5)

    # 3) bf16-operand matmul fast path (v6e/v7x MXU); f32 accumulation/elementwise
    out3 = jax.block_until_ready(
        actor_forward(state, goal, W_packed, P_packed,
                      hidden=H, action_dim=A, bf16_matmul=True))
    assert jnp.allclose(out3, ref, atol=1e-1, rtol=1e-1)

    print("KERNEL_OK")
</pallas_src>

<mosaic_0001>
module attributes {stable_mosaic.version = 11 : i64} {
  func.func @actor_kernel(%arg0: i32, %arg1: memref<8x16xf32, #tpu.memory_space<vmem>>, %arg2: memref<8x8xf32, #tpu.memory_space<vmem>>, %arg3: memref<192x128xf32, #tpu.memory_space<vmem>>, %arg4: memref<5x128xf32, #tpu.memory_space<vmem>>, %arg5: memref<8x4xf32, #tpu.memory_space<vmem>>) attributes {dimension_semantics = [#tpu.dimension_semantics<parallel>], iteration_bounds = array<i64: 1>, scalar_prefetch = 0 : i64, scratch_operands = 0 : i64, tpu.core_type = #tpu.core_type<tc>, window_params = [{transform_indices = @transform_0, window_bounds = array<i64: 8, 16>}, {transform_indices = @transform_1, window_bounds = array<i64: 8, 8>}, {pipeline_mode = #tpu.pipeline_mode<synchronous>, transform_indices = @transform_2, window_bounds = array<i64: 192, 128>}, {pipeline_mode = #tpu.pipeline_mode<synchronous>, transform_indices = @transform_3, window_bounds = array<i64: 5, 128>}, {transform_indices = @transform_4, window_bounds = array<i64: 8, 4>}]} {
    %c0 = arith.constant 0 : index
    %c0_0 = arith.constant 0 : index
    %0 = vector.load %arg3[%c0, %c0_0] : memref<192x128xf32, #tpu.memory_space<vmem>>, vector<192x128xf32>
    %c0_1 = arith.constant 0 : index
    %c0_2 = arith.constant 0 : index
    %1 = vector.load %arg4[%c0_1, %c0_2] : memref<5x128xf32, #tpu.memory_space<vmem>>, vector<5x128xf32>
    %2 = vector.extract_strided_slice %1 {offsets = [0, 0], sizes = [1, 64], strides = [1, 1]} : vector<5x128xf32> to vector<1x64xf32>
    %3 = vector.extract_strided_slice %1 {offsets = [1, 0], sizes = [1, 64], strides = [1, 1]} : vector<5x128xf32> to vector<1x64xf32>
    %4 = vector.extract_strided_slice %1 {offsets = [2, 0], sizes = [1, 4], strides = [1, 1]} : vector<5x128xf32> to vector<1x4xf32>
    %5 = vector.extract_strided_slice %1 {offsets = [3, 0], sizes = [1, 4], strides = [1, 1]} : vector<5x128xf32> to vector<1x4xf32>
    %6 = vector.extract_strided_slice %1 {offsets = [4, 0], sizes = [1, 4], strides = [1, 1]} : vector<5x128xf32> to vector<1x4xf32>
    %c0_3 = arith.constant 0 : index
    %c0_4 = arith.constant 0 : index
    %7 = vector.load %arg1[%c0_3, %c0_4] : memref<8x16xf32, #tpu.memory_space<vmem>>, vector<8x16xf32>
    %8 = vector.extract_strided_slice %0 {offsets = [0, 0], sizes = [16, 64], strides = [1, 1]} : vector<192x128xf32> to vector<16x64xf32>
    %cst = arith.constant dense<0.000000e+00> : vector<8x64xf32>
    %9 = tpu.matmul %7, %8, %cst {dimension_numbers = #tpu.dot_dimension_numbers<[1], [0], [0], [1], [0, 0, 1, 1], [], []>} : vector<8x16xf32>, vector<16x64xf32>, vector<8x64xf32> -> vector<8x64xf32>
    %c0_5 = arith.constant 0 : index
    %c0_6 = arith.constant 0 : index
    %10 = vector.load %arg2[%c0_5, %c0_6] : memref<8x8xf32, #tpu.memory_space<vmem>>, vector<8x8xf32>
    %11 = vector.extract_strided_slice %0 {offsets = [16, 0], sizes = [8, 64], strides = [1, 1]} : vector<192x128xf32> to vector<8x64xf32>
    %cst_7 = arith.constant dense<0.000000e+00> : vector<8x64xf32>
    %12 = tpu.matmul %10, %11, %cst_7 {dimension_numbers = #tpu.dot_dimension_numbers<[1], [0], [0], [1], [0, 0, 1, 1], [], []>} : vector<8x8xf32>, vector<8x64xf32>, vector<8x64xf32> -> vector<8x64xf32>
    %13 = arith.addf %9, %12 : vector<8x64xf32>
    %14 = vector.broadcast %2 : vector<1x64xf32> to vector<8x64xf32>
    %15 = arith.addf %13, %14 : vector<8x64xf32>
    %cst_8 = arith.constant 0.000000e+00 : f32
    %16 = vector.broadcast %cst_8 : f32 to vector<8x64xf32>
    %17 = arith.maximumf %15, %16 : vector<8x64xf32>
    %18 = vector.extract_strided_slice %0 {offsets = [64, 0], sizes = [64, 64], strides = [1, 1]} : vector<192x128xf32> to vector<64x64xf32>
    %cst_9 = arith.constant dense<0.000000e+00> : vector<8x64xf32>
    %19 = tpu.matmul %17, %18, %cst_9 {dimension_numbers = #tpu.dot_dimension_numbers<[1], [0], [0], [1], [0, 0, 1, 1], [], []>} : vector<8x64xf32>, vector<64x64xf32>, vector<8x64xf32> -> vector<8x64xf32>
    %20 = vector.broadcast %3 : vector<1x64xf32> to vector<8x64xf32>
    %21 = arith.addf %19, %20 : vector<8x64xf32>
    %cst_10 = arith.constant 0.000000e+00 : f32
    %22 = vector.broadcast %cst_10 : f32 to vector<8x64xf32>
    %23 = arith.maximumf %21, %22 : vector<8x64xf32>
    %24 = vector.extract_strided_slice %0 {offsets = [128, 0], sizes = [64, 4], strides = [1, 1]} : vector<192x128xf32> to vector<64x4xf32>
    %cst_11 = arith.constant dense<0.000000e+00> : vector<8x4xf32>
    %25 = tpu.matmul %23, %24, %cst_11 {dimension_numbers = #tpu.dot_dimension_numbers<[1], [0], [0], [1], [0, 0, 1, 1], [], []>} : vector<8x64xf32>, vector<64x4xf32>, vector<8x4xf32> -> vector<8x4xf32>
    %26 = vector.broadcast %4 : vector<1x4xf32> to vector<8x4xf32>
    %27 = arith.addf %25, %26 : vector<8x4xf32>
    %28 = math.tanh %27 : vector<8x4xf32>
    %29 = vector.broadcast %5 : vector<1x4xf32> to vector<8x4xf32>
    %30 = arith.mulf %28, %29 : vector<8x4xf32>
    %31 = vector.broadcast %6 : vector<1x4xf32> to vector<8x4xf32>
    %32 = arith.addf %30, %31 : vector<8x4xf32>
    %c0_12 = arith.constant 0 : index
    %c0_13 = arith.constant 0 : index
    %33 = vector.load %arg5[%c0_12, %c0_13] : memref<8x4xf32, #tpu.memory_space<vmem>>, vector<8x4xf32>
    tpu.vector_store %arg5[%c0_12, %c0_13], %32 {strides = array<i32>} : memref<8x4xf32, #tpu.memory_space<vmem>>, vector<8x4xf32>,
    return
  }
  func.func @transform_0(%arg0: i32) -> (i32, i32) {
    %c0_i32 = arith.constant 0 : i32
    %c0_i32_0 = arith.constant 0 : i32
    return %arg0, %c0_i32 : i32, i32
  }
  func.func @transform_1(%arg0: i32) -> (i32, i32) {
    %c0_i32 = arith.constant 0 : i32
    %c0_i32_0 = arith.constant 0 : i32
    return %arg0, %c0_i32 : i32, i32
  }
  func.func @transform_2(%arg0: i32) -> (i32, i32) {
    %c0_i32 = arith.constant 0 : i32
    %c0_i32_0 = arith.constant 0 : i32
    %c0_i32_1 = arith.constant 0 : i32
    return %c0_i32, %c0_i32_0 : i32, i32
  }
  func.func @transform_3(%arg0: i32) -> (i32, i32) {
    %c0_i32 = arith.constant 0 : i32
    %c0_i32_0 = arith.constant 0 : i32
    %c0_i32_1 = arith.constant 0 : i32
    return %c0_i32, %c0_i32_0 : i32, i32
  }
  func.func @transform_4(%arg0: i32) -> (i32, i32) {
    %c0_i32 = arith.constant 0 : i32
    %c0_i32_0 = arith.constant 0 : i32
    return %arg0, %c0_i32 : i32, i32
  }
}

</mosaic_0001>

<bundles_post_ra>
// kernel: actor_forward.1
= control target key start
LH: loop header
LB: loop body
LE: loop exit
PB: predicated region body
PF: predicated region fallthrough
CT: control target
= control target key end

     0   :  { %9 = vsyncpa [#allocation3], 0  ;;  %s371_s0 = inlined_call_operand.hbm [shape: f32[8,16], index: 0, kind: input, shape index: {}]   ;;  %s372_s1 = inlined_call_operand.hbm [shape: f32[8,8], index: 1, kind: input, shape index: {}]   ;;  %s373_s2 = inlined_call_operand.hbm [shape: f32[192,128], index: 2, kind: input, shape index: {}]   ;;  %s374_s3 = inlined_call_operand.hbm [shape: f32[5,128], index: 3, kind: input, shape index: {}]   ;;  %s375_s4 = inlined_call_operand.vmem [shape: f32[8,4], index: 4, kind: output, shape index: {}]  }
   0x1   :  { %10 = vsyncpa [#allocation5], 0  ;;  %s28_s17 = sshll.u32 %s372_s1, 4  ;;  %s29_s17 = int_to_ptr.hbm [resolvable:$true] %s28_s17 }
   0x2   :  { %11 = vsyncpa [#allocation8], 0  ;;  %s325_s18 = smov [#allocation4]   ;;  %s17_s22 = sshll.u32 %s371_s0, 4  ;;  %s18_s22 = int_to_ptr.hbm [resolvable:$true] %s17_s22 }
   0x3   :  { %s30_s19 = sshll.u32 %s325_s18, 4  ;;  %s326_s23 = smov [#allocation2]   ;;  %s31_s19 = int_to_ptr.vmem [resolvable:$true] %s30_s19 }
   0x4   :  { %33 = dma.hbm_to_vmem [thread:$0]  %s29_s17, 128, %s31_s19, [#allocation5]  }
   0x5   :  { %s19_s24 = sshll.u32 %s326_s23, 4  ;;  %s38_s27 = sshll.u32 %s373_s2, 4  ;;  %s20_s24 = int_to_ptr.vmem [resolvable:$true] %s19_s24  ;;  %s39_s27 = int_to_ptr.hbm [resolvable:$true] %s38_s27 }
   0x6   :  { %22 = dma.hbm_to_vmem [thread:$0]  %s18_s22, 128, %s20_s24, [#allocation3]  }
   0x7   :  { %s327_s1 = smov [#allocation6]   ;;  %s52_s5 = sshll.u32 %s374_s3, 4  ;;  %s53_s5 = int_to_ptr.hbm [resolvable:$true] %s52_s5 }
   0x8   :  { %s40_s28 = sshll.u32 %s327_s1, 4  ;;  %s328_s6 = smov 128   ;;  %s41_s28 = int_to_ptr.vmem [resolvable:$true] %s40_s28 }
   0x9   :  { %s329_s0 = smov 8   ;;  %s330_s7 = smov [#allocation7]  }
   0xa   :  { %46 = dma.hbm_to_vmem [thread:$0]  %s39_s27, 3072, %s41_s28, [#allocation5], %s328_s6, %s328_s6, %s329_s0  }
   0xb   :  { %s54_s8 = sshll.u32 %s330_s7, 4  ;;  %s55_s8 = int_to_ptr.vmem [resolvable:$true] %s54_s8 }
   0xc   :  { %57 = dma.hbm_to_vmem [thread:$0]  %s53_s5, 128, %s55_s8, [#allocation8]  }
   0xd   :  { %319 = dma.done.wait [#allocation3], 128  }
   0xe   :  { %320 = vsyncadd [#allocation3], 4294967168 }
   0xf   :  { %321 = dma.done.wait [#allocation5], 3200  }
  0x10   :  { %322 = vsyncadd [#allocation5], 4294964096 }
  0x11   :  { %323 = dma.done.wait [#allocation8], 128  }
  0x12   :  { %324 = vsyncadd [#allocation8], 4294967168  ;;  %vm96_vm0 = vcmask 64512   ;;  %v75_v0 = vld [vmem:[#allocation6 + $0x8] sm:$0xff]  ;;  %v76_v1 = vld [vmem:[#allocation6 + $0x10] sm:$0xff]  ;;  %vm120_vm1 = vcmask 130048  }
  0x13   :  { %v74_v2 = vld [vmem:[#allocation6] sm:$0xff]  ;;  %138 = vmatpush.msra.mxu1 %v75_v0  ;;  %115 = vmatpush.msra.mxu0 %v76_v1  ;;  %v95_v3 = vld [vmem:[#allocation4] sm:$0xff]  ;;  %v94_v4 = vld [vmem:[#allocation2] sm:$0xff]  ;;  %vm148_vm2 = vcmask 523264   ;;  %vm202_vm3 = vcmask 31744  }
  0x14   :  { %v84_v5 = vld [vmem:[#allocation6 + $0x78] sm:$0xff]  ;;  %211 = vmatmul.msk.f32.vlgmr.msra.gmra.mxu0 %vm96_vm0, %v95_v3  ;;  %v83_v6 = vld [vmem:[#allocation6 + $0x70] sm:$0xff]  ;;  %v82_v7 = vld [vmem:[#allocation6 + $0x68] sm:$0xff] }
  0x15   :  { %160 = vmatpush.msra.mxu2 %v84_v5  ;;  %139 = vmatpush.msra.mxu1 %v74_v2  ;;  %v81_v8 = vld [vmem:[#allocation6 + $0x60] sm:$0xff]  ;;  %v80_v9 = vld [vmem:[#allocation6 + $0x58] sm:$0xff]  ;;  %v79_v10 = vld [vmem:[#allocation6 + $0x50] sm:$0xff] }
  0x16   :  { %212 = vmatmul.msk.f32.vlgmr.msra.gmra.mxu1 %vm120_vm1, %v94_v4  ;;  %v78_v11 = vld [vmem:[#allocation6 + $0x48] sm:$0xff]  ;;  %v77_v12 = vld [vmem:[#allocation6 + $0x40] sm:$0xff]  ;;  %v92_v13 = vld [vmem:[#allocation6 + $0xb8] sm:$0xff] }
  0x17   :  { %161 = vmatpush.msra.mxu2 %v83_v6  ;;  %v91_v14 = vld [vmem:[#allocation6 + $0xb0] sm:$0xff]  ;;  %185 = vmatpush.msra.mxu3 %v92_v13  ;;  %v90_v15 = vld [vmem:[#allocation6 + $0xa8] sm:$0xff]  ;;  %v89_v16 = vld [vmem:[#allocation6 + $0xa0] sm:$0xff] }
  0x18   :  { %v88_v17 = vld [vmem:[#allocation6 + $0x98] sm:$0xff]  ;;  %v93_v18 = vld [vmem:[#allocation7] sm:$0x1f]  ;;  %v87_v25 = vld [vmem:[#allocation6 + $0x90] sm:$0xff] }
  0x19   :  { %162 = vmatpush.msra.mxu2 %v82_v7  ;;  %186 = vmatpush.msra.mxu3 %v91_v14  ;;  %v144_v20 = vperm.slane %v93_v18, 0  ;;  %v86_v26 = vld [vmem:[#allocation6 + $0x88] sm:$0xff]  ;;  %v85_v27 = vld [vmem:[#allocation6 + $0x80] sm:$0xff]  ;;  %v147_v28 = vperm.slane %v93_v18, 1  ;;  %v173_v32 = vperm.slane %v93_v18, 2  ;;  %v198_v35 = vperm.slane %v93_v18, 3 }
  0x1a   :  { %v200_v36 = vperm.slane %v93_v18, 4 }
  0x1b   :  { %163 = vmatpush.msra.mxu2 %v81_v8  ;;  %187 = vmatpush.msra.mxu3 %v90_v15 }
  0x1d   :  { %164 = vmatpush.msra.mxu2 %v80_v9  ;;  %188 = vmatpush.msra.mxu3 %v89_v16 }
  0x1f   :  { %165 = vmatpush.msra.mxu2 %v79_v10  ;;  %189 = vmatpush.msra.mxu3 %v88_v17 }
  0x21   :  { %166 = vmatpush.msra.mxu2 %v78_v11  ;;  %190 = vmatpush.msra.mxu3 %v87_v25 }
  0x23   :  { %167 = vmatpush.msra.mxu2 %v77_v12  ;;  %191 = vmatpush.msra.mxu3 %v86_v26 }
  0x25   :  { %192 = vmatpush.msra.mxu3 %v85_v27 }
  0x91   :  { %v117_v19 = vpop.f32.mrf.mxu0 }
  0x93   :  { %v141_v21 = vpop.f32.mrf.mxu1 }
  0x94   :  { %v142_v22 = vadd.f32 %v141_v21, %v117_v19 }
  0x96   :  { %v145_v23 = vadd.f32 %v144_v20, %v142_v22 }
  0x98   :  { %v146_v24 = vmax.f32 %v145_v23, 0.0 }
  0x9a   :  { %213 = vmatmul.msk.f32.vlgmr.msra.gmra.mxu2 %vm148_vm2, %v146_v24 }
 0x11d   :  { %v169_v29 = vpop.f32.mrf.mxu2 }
 0x11e   :  { %v170_v30 = vadd.f32 %v169_v29, %v147_v28 }
 0x120   :  { %v172_v31 = vmax.f32 %v170_v30, 0.0 }
 0x122   :  { %214 = vmatmul.msk.f32.vlgmr.msra.gmra.mxu3 %vm148_vm2, %v172_v31 }
 0x1a5   :  { %v194_v33 = vpop.f32.mrf.mxu3 }
 0x1a6   :  { %v195_v34 = vadd.f32 %v194_v33, %v173_v32 }
 0x1a8   :  { %221 = vtanh.f32 %v195_v34 }
 0x1ae   :  { %v222_v37 = vpop.eup %221 }
 0x1af   :  { %v199_v38 = vmul.f32 %v222_v37, %v198_v35 }
 0x1b1   :  { %v201_v39 = vadd.f32 %v200_v36, %v199_v38 }
 0x1b3   :  { %203 = vst.msk [vmem:[%s375_s4] sm:$0xff] %vm202_vm3, %v201_v39 }
 0x1b4   :  { %208 = vsyncpa [#allocation3], 1 }
 0x1b5   :  { %209 = vsyncpa [#allocation5], 1 }
 0x1b6   :  { %210 = vsyncpa [#allocation8], 1 }

</bundles_post_ra>
